<compile_context>
chip_gen: v6e
topology: v6e:2x2x1
jax: 0.10.0
libtpu: 0.0.40
codegen_flags: <defaults>
</compile_context>

<pallas_src>
import jax
import jax.numpy as jnp
from jax.experimental import pallas as pl
from jax.experimental.pallas import tpu as pltpu

IMG_WIDTH = IMG_HEIGHT = 28
INPUT_SIZE = IMG_WIDTH * IMG_HEIGHT            # 784
FIRST_HIDDEN_LAYER_SIZE = 128
SECOND_HIDDEN_LAYER_SIZE = 64
NUM_CLASSES = 10

H2_PAD = 128    # second hidden dim padded 64 -> 128 (lane-dense intermediate)
N_PAD = 128     # output lane dim padded 10 -> 128 (lane-dense, unmasked stores)
MAX_TM = 1024   # max batch-tile rows; double-buffered f32 tiles fit 32 MiB VMEM


def _round_up(x, m):
    return (x + m - 1) // m * m


def _choose_tiling(batch):
    """Pick (tile_rows, padded_batch, num_steps) for the batch grid."""
    b8 = _round_up(max(batch, 1), 8)
    # At least 2 grid steps when there is enough work so v7x's 2 TensorCores both
    # get a share (harmless ~0.35us extra step on single-TC v5e/v6e).
    min_steps = 2 if b8 >= 16 else 1
    n_steps = max(min_steps, pl.cdiv(b8, MAX_TM))
    tm = _round_up(pl.cdiv(b8, n_steps), 8)
    b_pad = tm * n_steps            # padding is at most a few rows, never ~2x batch
    return tm, b_pad, n_steps


def _mlp_kernel(x_ref, w1_ref, b1_ref, w2_ref, b2_ref, w3_ref, b3_ref, o_ref):
    # x tile arrives as f32 straight from HBM; cast to bf16 in VMEM for the MXU.
    x = x_ref[...].astype(jnp.bfloat16)

    h1 = jnp.dot(x, w1_ref[...], preferred_element_type=jnp.float32)
    h1 = jnp.maximum(h1 + b1_ref[...], 0.0)

    h2 = jnp.dot(h1.astype(jnp.bfloat16), w2_ref[...],
                 preferred_element_type=jnp.float32)
    h2 = jnp.maximum(h2 + b2_ref[...], 0.0)

    out = jnp.dot(h2.astype(jnp.bfloat16), w3_ref[...],
                  preferred_element_type=jnp.float32)
    o_ref[...] = (out + b3_ref[...]).astype(o_ref.dtype)


def prepare_params(params):
    """One-time prep: bf16 cast + zero-pad weights/biases to lane-dense shapes."""
    w1, b1, w2, b2, w3, b3 = params

    w1_p = w1.astype(jnp.bfloat16)                                   # (784, 128)
    b1r = b1.reshape(1, -1).astype(jnp.float32)                      # (1, 128)

    w2_p = jnp.zeros((FIRST_HIDDEN_LAYER_SIZE, H2_PAD), jnp.bfloat16)
    w2_p = w2_p.at[:, :SECOND_HIDDEN_LAYER_SIZE].set(w2.astype(jnp.bfloat16))
    b2r = jnp.zeros((1, H2_PAD), jnp.float32)
    b2r = b2r.at[:, :SECOND_HIDDEN_LAYER_SIZE].set(
        b2.reshape(1, -1).astype(jnp.float32))

    w3_p = jnp.zeros((H2_PAD, N_PAD), jnp.bfloat16)
    w3_p = w3_p.at[:SECOND_HIDDEN_LAYER_SIZE, :NUM_CLASSES].set(
        w3.astype(jnp.bfloat16))
    b3r = jnp.zeros((1, N_PAD), jnp.float32)
    b3r = b3r.at[:, :NUM_CLASSES].set(b3.reshape(1, -1).astype(jnp.float32))

    return (w1_p, b1r, w2_p, b2r, w3_p, b3r)


def feedforward_pallas(x, prepped_params):
    """x: [B, 1, 28, 28] or [B, 784] float32. Returns logits [B, NUM_CLASSES] f32."""
    w1_p, b1r, w2_p, b2r, w3_p, b3r = prepped_params

    batch = x.shape[0]
    x_flat = x.reshape(batch, -1).astype(jnp.float32)   # same as torch reshape(B, -1)
    assert x_flat.shape[1] == INPUT_SIZE

    tm, b_pad, n_steps = _choose_tiling(batch)
    if b_pad != batch:
        # Only a handful of rows (round-up to 8 / step count); zero rows are exact.
        x_flat = jnp.pad(x_flat, ((0, b_pad - batch), (0, 0)))

    # Weights/biases: same block every grid step -> DMA'd once, stay VMEM-resident.
    resident = lambda a: pl.BlockSpec(a.shape, lambda i: (0,) * a.ndim)

    flops = 2 * b_pad * (INPUT_SIZE * FIRST_HIDDEN_LAYER_SIZE
                         + FIRST_HIDDEN_LAYER_SIZE * H2_PAD
                         + H2_PAD * N_PAD)
    bytes_accessed = (x_flat.size * 4
                      + (w1_p.size + w2_p.size + w3_p.size) * 2
                      + (b1r.size + b2r.size + b3r.size) * 4
                      + b_pad * N_PAD * 2)

    out = pl.pallas_call(
        _mlp_kernel,
        out_shape=jax.ShapeDtypeStruct((b_pad, N_PAD), jnp.bfloat16),
        grid=(n_steps,),
        in_specs=[
            # Full-extent 784 last dim is legal; avoids any host-side K padding.
            pl.BlockSpec((tm, INPUT_SIZE), lambda i: (i, 0)),
            resident(w1_p), resident(b1r),
            resident(w2_p), resident(b2r),
            resident(w3_p), resident(b3r),
        ],
        out_specs=pl.BlockSpec((tm, N_PAD), lambda i: (i, 0)),
        compiler_params=pltpu.CompilerParams(
            dimension_semantics=("parallel",),
            vmem_limit_bytes=32 * 1024 * 1024),
        cost_estimate=pl.CostEstimate(flops=flops, transcendentals=0,
                                      bytes_accessed=bytes_accessed),
    )(x_flat, w1_p, b1r, w2_p, b2r, w3_p, b3r)

    return out[:batch, :NUM_CLASSES].astype(jnp.float32)


def init_params(key):
    """Deterministic init mimicking torch.nn.Linear default (Kaiming-uniform)."""
    ks = jax.random.split(key, 6)

    def linear(kw, kb, fan_in, fan_out):
        bound = 1.0 / jnp.sqrt(fan_in)
        w = jax.random.uniform(kw, (fan_in, fan_out), jnp.float32, -bound, bound)
        b = jax.random.uniform(kb, (fan_out,), jnp.float32, -bound, bound)
        return w, b

    w1, b1 = linear(ks[0], ks[1], INPUT_SIZE, FIRST_HIDDEN_LAYER_SIZE)
    w2, b2 = linear(ks[2], ks[3], FIRST_HIDDEN_LAYER_SIZE, SECOND_HIDDEN_LAYER_SIZE)
    w3, b3 = linear(ks[4], ks[5], SECOND_HIDDEN_LAYER_SIZE, NUM_CLASSES)
    return (w1, b1, w2, b2, w3, b3)


def feedforward_ref(x, params):
    """Pure-JAX f32 reference of the PyTorch forward."""
    w1, b1, w2, b2, w3, b3 = params
    out = x.reshape(x.shape[0], -1)
    out = jnp.maximum(out @ w1 + b1, 0.0)
    out = jnp.maximum(out @ w2 + b2, 0.0)
    return out @ w3 + b3


if __name__ == "__main__":
    key = jax.random.PRNGKey(0)
    k_param, k_x1, k_x2 = jax.random.split(key, 3)

    params = init_params(k_param)
    prepped = prepare_params(params)           # one-time weight prep (hoisted)

    forward = jax.jit(feedforward_pallas)

    # Small MNIST-like batch: NCHW [2, 1, 28, 28]
    x_small = jax.random.normal(k_x1, (2, 1, IMG_HEIGHT, IMG_WIDTH), jnp.float32)
    y_small = jax.block_until_ready(forward(x_small, prepped))
    y_small_ref = feedforward_ref(x_small, params)
    assert y_small.shape == (2, NUM_CLASSES)
    # bf16 matmul inputs / bf16 logit store (f32 accumulation) vs f32 reference.
    assert jnp.allclose(y_small, y_small_ref, atol=2e-2, rtol=2e-2), "mismatch (batch=2)"

    # Exercise the multi-step batch-tiled path (2 grid steps -> both v7x TCs).
    x_big = jax.random.normal(k_x2, (64, 1, IMG_HEIGHT, IMG_WIDTH), jnp.float32)
    y_big = jax.block_until_ready(forward(x_big, prepped))
    y_big_ref = feedforward_ref(x_big, params)
    assert y_big.shape == (64, NUM_CLASSES)
    assert jnp.allclose(y_big, y_big_ref, atol=2e-2, rtol=2e-2), "mismatch (batch=64)"

    print("KERNEL_OK")
</pallas_src>

<mosaic_0001>
module attributes {stable_mosaic.version = 11 : i64} {
  func.func @_mlp_kernel(%arg0: i32, %arg1: memref<8x784xf32, #tpu.memory_space<vmem>>, %arg2: memref<784x128xbf16, #tpu.memory_space<vmem>>, %arg3: memref<1x128xf32, #tpu.memory_space<vmem>>, %arg4: memref<128x128xbf16, #tpu.memory_space<vmem>>, %arg5: memref<1x128xf32, #tpu.memory_space<vmem>>, %arg6: memref<128x128xbf16, #tpu.memory_space<vmem>>, %arg7: memref<1x128xf32, #tpu.memory_space<vmem>>, %arg8: memref<8x128xbf16, #tpu.memory_space<vmem>>) attributes {dimension_semantics = [#tpu.dimension_semantics<parallel>], iteration_bounds = array<i64: 1>, scalar_prefetch = 0 : i64, scratch_operands = 0 : i64, tpu.core_type = #tpu.core_type<tc>, window_params = [{transform_indices = @transform_0, window_bounds = array<i64: 8, 784>}, {pipeline_mode = #tpu.pipeline_mode<synchronous>, transform_indices = @transform_1, window_bounds = array<i64: 784, 128>}, {pipeline_mode = #tpu.pipeline_mode<synchronous>, transform_indices = @transform_2, window_bounds = array<i64: 1, 128>}, {pipeline_mode = #tpu.pipeline_mode<synchronous>, transform_indices = @transform_3, window_bounds = array<i64: 128, 128>}, {pipeline_mode = #tpu.pipeline_mode<synchronous>, transform_indices = @transform_4, window_bounds = array<i64: 1, 128>}, {pipeline_mode = #tpu.pipeline_mode<synchronous>, transform_indices = @transform_5, window_bounds = array<i64: 128, 128>}, {pipeline_mode = #tpu.pipeline_mode<synchronous>, transform_indices = @transform_6, window_bounds = array<i64: 1, 128>}, {transform_indices = @transform_7, window_bounds = array<i64: 8, 128>}]} {
    %c0 = arith.constant 0 : index
    %c0_0 = arith.constant 0 : index
    %0 = vector.load %arg1[%c0, %c0_0] : memref<8x784xf32, #tpu.memory_space<vmem>>, vector<8x784xf32>
    %1 = arith.truncf %0 : vector<8x784xf32> to vector<8x784xbf16>
    %c0_1 = arith.constant 0 : index
    %c0_2 = arith.constant 0 : index
    %2 = vector.load %arg2[%c0_1, %c0_2] : memref<784x128xbf16, #tpu.memory_space<vmem>>, vector<784x128xbf16>
    %cst = arith.constant dense<0.000000e+00> : vector<8x128xf32>
    %3 = tpu.matmul %1, %2, %cst {dimension_numbers = #tpu.dot_dimension_numbers<[1], [0], [0], [1], [0, 0, 1, 1], [], []>} : vector<8x784xbf16>, vector<784x128xbf16>, vector<8x128xf32> -> vector<8x128xf32>
    %c0_3 = arith.constant 0 : index
    %c0_4 = arith.constant 0 : index
    %4 = vector.load %arg3[%c0_3, %c0_4] : memref<1x128xf32, #tpu.memory_space<vmem>>, vector<1x128xf32>
    %5 = vector.broadcast %4 : vector<1x128xf32> to vector<8x128xf32>
    %6 = arith.addf %3, %5 : vector<8x128xf32>
    %cst_5 = arith.constant 0.000000e+00 : f32
    %7 = vector.broadcast %cst_5 : f32 to vector<8x128xf32>
    %8 = arith.maximumf %6, %7 : vector<8x128xf32>
    %9 = arith.truncf %8 : vector<8x128xf32> to vector<8x128xbf16>
    %c0_6 = arith.constant 0 : index
    %c0_7 = arith.constant 0 : index
    %10 = vector.load %arg4[%c0_6, %c0_7] : memref<128x128xbf16, #tpu.memory_space<vmem>>, vector<128x128xbf16>
    %cst_8 = arith.constant dense<0.000000e+00> : vector<8x128xf32>
    %11 = tpu.matmul %9, %10, %cst_8 {dimension_numbers = #tpu.dot_dimension_numbers<[1], [0], [0], [1], [0, 0, 1, 1], [], []>} : vector<8x128xbf16>, vector<128x128xbf16>, vector<8x128xf32> -> vector<8x128xf32>
    %c0_9 = arith.constant 0 : index
    %c0_10 = arith.constant 0 : index
    %12 = vector.load %arg5[%c0_9, %c0_10] : memref<1x128xf32, #tpu.memory_space<vmem>>, vector<1x128xf32>
    %13 = vector.broadcast %12 : vector<1x128xf32> to vector<8x128xf32>
    %14 = arith.addf %11, %13 : vector<8x128xf32>
    %cst_11 = arith.constant 0.000000e+00 : f32
    %15 = vector.broadcast %cst_11 : f32 to vector<8x128xf32>
    %16 = arith.maximumf %14, %15 : vector<8x128xf32>
    %17 = arith.truncf %16 : vector<8x128xf32> to vector<8x128xbf16>
    %c0_12 = arith.constant 0 : index
    %c0_13 = arith.constant 0 : index
    %18 = vector.load %arg6[%c0_12, %c0_13] : memref<128x128xbf16, #tpu.memory_space<vmem>>, vector<128x128xbf16>
    %cst_14 = arith.constant dense<0.000000e+00> : vector<8x128xf32>
    %19 = tpu.matmul %17, %18, %cst_14 {dimension_numbers = #tpu.dot_dimension_numbers<[1], [0], [0], [1], [0, 0, 1, 1], [], []>} : vector<8x128xbf16>, vector<128x128xbf16>, vector<8x128xf32> -> vector<8x128xf32>
    %c0_15 = arith.constant 0 : index
    %c0_16 = arith.constant 0 : index
    %20 = vector.load %arg7[%c0_15, %c0_16] : memref<1x128xf32, #tpu.memory_space<vmem>>, vector<1x128xf32>
    %21 = vector.broadcast %20 : vector<1x128xf32> to vector<8x128xf32>
    %22 = arith.addf %19, %21 : vector<8x128xf32>
    %23 = arith.truncf %22 : vector<8x128xf32> to vector<8x128xbf16>
    %c0_17 = arith.constant 0 : index
    %c0_18 = arith.constant 0 : index
    %24 = vector.load %arg8[%c0_17, %c0_18] : memref<8x128xbf16, #tpu.memory_space<vmem>>, vector<8x128xbf16>
    tpu.vector_store %arg8[%c0_17, %c0_18], %23 {strides = array<i32>} : memref<8x128xbf16, #tpu.memory_space<vmem>>, vector<8x128xbf16>,
    return
  }
  func.func @transform_0(%arg0: i32) -> (i32, i32) {
    %c0_i32 = arith.constant 0 : i32
    %c0_i32_0 = arith.constant 0 : i32
    return %arg0, %c0_i32 : i32, i32
  }
  func.func @transform_1(%arg0: i32) -> (i32, i32) {
    %c0_i32 = arith.constant 0 : i32
    %c0_i32_0 = arith.constant 0 : i32
    %c0_i32_1 = arith.constant 0 : i32
    return %c0_i32, %c0_i32_0 : i32, i32
  }
  func.func @transform_2(%arg0: i32) -> (i32, i32) {
    %c0_i32 = arith.constant 0 : i32
    %c0_i32_0 = arith.constant 0 : i32
    %c0_i32_1 = arith.constant 0 : i32
    return %c0_i32, %c0_i32_0 : i32, i32
  }
  func.func @transform_3(%arg0: i32) -> (i32, i32) {
    %c0_i32 = arith.constant 0 : i32
    %c0_i32_0 = arith.constant 0 : i32
    %c0_i32_1 = arith.constant 0 : i32
    return %c0_i32, %c0_i32_0 : i32, i32
  }
  func.func @transform_4(%arg0: i32) -> (i32, i32) {
    %c0_i32 = arith.constant 0 : i32
    %c0_i32_0 = arith.constant 0 : i32
    %c0_i32_1 = arith.constant 0 : i32
    return %c0_i32, %c0_i32_0 : i32, i32
  }
  func.func @transform_5(%arg0: i32) -> (i32, i32) {
    %c0_i32 = arith.constant 0 : i32
    %c0_i32_0 = arith.constant 0 : i32
    %c0_i32_1 = arith.constant 0 : i32
    return %c0_i32, %c0_i32_0 : i32, i32
  }
  func.func @transform_6(%arg0: i32) -> (i32, i32) {
    %c0_i32 = arith.constant 0 : i32
    %c0_i32_0 = arith.constant 0 : i32
    %c0_i32_1 = arith.constant 0 : i32
    return %c0_i32, %c0_i32_0 : i32, i32
  }
  func.func @transform_7(%arg0: i32) -> (i32, i32) {
    %c0_i32 = arith.constant 0 : i32
    %c0_i32_0 = arith.constant 0 : i32
    return %arg0, %c0_i32 : i32, i32
  }
}

</mosaic_0001>

<bundles_post_ra>
// kernel: feedforward_pallas.1
= control target key start
LH: loop header
LB: loop body
LE: loop exit
PB: predicated region body
PF: predicated region fallthrough
CT: control target
= control target key end

     0   :  { %12 = vsyncpa [#allocation3], 0  ;;  %s1144_s24 = smov [#allocation2]   ;;  %s1296_s0 = inlined_call_operand.vmem [shape: f32[8,784], index: 0, kind: input, shape index: {}]   ;;  %s1297_s1 = inlined_call_operand.hbm [shape: bf16[784,128], index: 1, kind: input, shape index: {}]   ;;  %s1298_s2 = inlined_call_operand.vmem [shape: f32[1,128], index: 2, kind: input, shape index: {}]   ;;  %s1299_s3 = inlined_call_operand.vmem [shape: bf16[128,128], index: 3, kind: input, shape index: {}]   ;;  %s1300_s4 = inlined_call_operand.vmem [shape: f32[1,128], index: 4, kind: input, shape index: {}]   ;;  %s1301_s5 = inlined_call_operand.vmem [shape: bf16[128,128], index: 5, kind: input, shape index: {}]   ;;  %s1302_s6 = inlined_call_operand.vmem [shape: f32[1,128], index: 6, kind: input, shape index: {}]   ;;  %s1303_s7 = inlined_call_operand.vmem [shape: bf16[8,128], index: 7, kind: output, shape index: {}]  }
   0x1   :  { %s20_s25 = sshll.u32 %s1144_s24, 4  ;;  %s21_s25 = int_to_ptr.vmem [resolvable:$true] %s20_s25 }
   0x2   :  { %s1130_s26 = scalar_lea.vmem %s21_s25, 6272  ;;  %p1135_p1 = scmp.lt.s32.totalorder %s21_s25, %s21_s25 }
   0x3   :  { %p1131_p0 = scmp.ne.s32.totalorder %s21_s25, %s1130_s26  ;;  %p1136_p2 = scmp.lt.s32.totalorder %s1130_s26, %s1130_s26 }
   0x5   :  { %p1137_p3 = por %p1136_p2, %p1135_p1 }
   0x7   :  { %p1138_p4 = pnand %p1137_p3, %p1131_p0 }
   0x9   :  { %1141 = shalt.err (!%p1138_p4)
}
   0xa   :  { %s1145_s27 = smov 64   ;;  %s1146_s28 = smov 4  }
   0xb   :  { %26 = dma.hbm_to_vmem [thread:$0]  %s1297_s1, 6272, %s21_s25, [#allocation3], %s1145_s27, %s1145_s27, %s1146_s28  }
   0xc   :  { %1142 = dma.done.wait [#allocation3], 6272  }
   0xd   :  { %1143 = vsyncadd [#allocation3], 4294961024  ;;  %v1057_v0 = vld [vmem:[#allocation2 + $0x78] sm:$0xff]   ;;  %v1061_v4 = vld [vmem:[#allocation2 + $0x70] sm:$0xff]   ;;  %v1147_v44 = vmov 0.0   ;;  %vm1148_vm0 = vmmov 0  }
   0xe   :  { %v1058_v1 = vld [vmem:[#allocation2 + $0x38] sm:$0xff]   ;;  %920 = vmatprep.subr.bf16.mxu0 %v1057_v0  ;;  %v1062_v5 = vld [vmem:[#allocation2 + $0x30] sm:$0xff]   ;;  %v1065_v8 = vld [vmem:[#allocation2 + $0x68] sm:$0xff]   ;;  %vm454_vm1 = vcmask 130048  }
   0xf   :  { %v1059_v2 = vld [vmem:[#allocation2 + $0xf8] sm:$0xff]   ;;  %921 = vmatpush3.bf16.msra.mxu0 %v1058_v1  ;;  %v1063_v6 = vld [vmem:[#allocation2 + $0xf0] sm:$0xff]   ;;  %v1066_v9 = vld [vmem:[#allocation2 + $0x28] sm:$0xff]  }
  0x10   :  { %v1060_v3 = vld [vmem:[#allocation2 + $0xb8] sm:$0xff]   ;;  %942 = vmatprep.subr.bf16.mxu1 %v1059_v2  ;;  %922 = vmatprep.subr.bf16.mxu0 %v1061_v4  ;;  %v1064_v7 = vld [vmem:[#allocation2 + $0xb0] sm:$0xff]   ;;  %v1067_v10 = vld [vmem:[#allocation2 + $0xe8] sm:$0xff]  }
  0x11   :  { %943 = vmatpush3.bf16.msra.mxu1 %v1060_v3  ;;  %v1068_v11 = vld [vmem:[#allocation2 + $0xa8] sm:$0xff]   ;;  %v1069_v12 = vld [vmem:[#allocation2 + $0x60] sm:$0xff]   ;;  %v1073_v16 = vld [vmem:[#allocation2 + $0x58] sm:$0xff]  }
  0x12   :  { %944 = vmatprep.subr.bf16.mxu1 %v1063_v6  ;;  %v1070_v13 = vld [vmem:[#allocation2 + $0x20] sm:$0xff]   ;;  %v1074_v17 = vld [vmem:[#allocation2 + $0x18] sm:$0xff]   ;;  %v1077_v20 = vld [vmem:[#allocation2 + $0x50] sm:$0xff]  }
  0x13   :  { %923 = vmatpush3.bf16.msra.mxu0 %v1062_v5  ;;  %v1071_v14 = vld [vmem:[#allocation2 + $0xe0] sm:$0xff]   ;;  %v1075_v18 = vld [vmem:[#allocation2 + $0xd8] sm:$0xff]   ;;  %v1078_v21 = vld [vmem:[#allocation2 + $0x10] sm:$0xff]  }
  0x14   :  { %924 = vmatprep.subr.bf16.mxu0 %v1065_v8  ;;  %v1072_v15 = vld [vmem:[#allocation2 + $0xa0] sm:$0xff]   ;;  %v1076_v19 = vld [vmem:[#allocation2 + $0x98] sm:$0xff]   ;;  %v1079_v22 = vld [vmem:[#allocation2 + $0xd0] sm:$0xff]  }
  0x15   :  { %945 = vmatpush3.bf16.msra.mxu1 %v1064_v7  ;;  %v1080_v23 = vld [vmem:[#allocation2 + $0x90] sm:$0xff]   ;;  %v1081_v24 = vld [vmem:[#allocation2 + $0x48] sm:$0xff]   ;;  %v1085_v28 = vld [vmem:[#allocation2 + $0x40] sm:$0xff]  }
  0x16   :  { %946 = vmatprep.subr.bf16.mxu1 %v1067_v10  ;;  %v1082_v25 = vld [vmem:[#allocation2 + $0x8] sm:$0xff]   ;;  %v1086_v29 = vld [vmem:[#allocation2] sm:$0xff]   ;;  %v1089_v36 = vld [vmem:[#allocation2 + $0x178] sm:$0xff]  }
  0x17   :  { %925 = vmatpush3.bf16.msra.mxu0 %v1066_v9  ;;  %v1083_v26 = vld [vmem:[#allocation2 + $0xc8] sm:$0xff]   ;;  %v1087_v30 = vld [vmem:[#allocation2 + $0xc0] sm:$0xff]   ;;  %v44_v37 = vld [vmem:[%s1296_s0 + $0x18] sm:$0xff] }
  0x18   :  { %926 = vmatprep.subr.bf16.mxu0 %v1069_v12  ;;  %v1084_v27 = vld [vmem:[#allocation2 + $0x88] sm:$0xff]   ;;  %v1088_v33 = vld [vmem:[#allocation2 + $0x80] sm:$0xff]   ;;  %v51_v38 = vpack.c.bf16 %v44_v37, %v44_v37  ;;  %v1090_v39 = vld [vmem:[#allocation2 + $0x138] sm:$0xff]  }
  0x19   :  { %947 = vmatpush3.bf16.msra.mxu1 %v1068_v11  ;;  %v42_v31 = vld [vmem:[%s1296_s0 + $0x8] sm:$0xff]  ;;  %v41_v34 = vld [vmem:[%s1296_s0] sm:$0xff]  ;;  %v43_v40 = vld [vmem:[%s1296_s0 + $0x10] sm:$0xff] }
  0x1a   :  { %948 = vmatprep.subr.bf16.mxu1 %v1071_v14  ;;  %v49_v32 = vpack.c.bf16 %v42_v31, %v42_v31  ;;  %v48_v35 = vpack.c.bf16 %v41_v34, %v41_v34  ;;  %530 = vmatprep.mubr.bf16.mxu1 %v51_v38  ;;  %v50_v41 = vpack.c.bf16 %v43_v40, %v43_v40  ;;  %v1091_v42 = vld [vmem:[#allocation2 + $0x170] sm:$0xff]   ;;  %v1093_v45 = vld [vmem:[#allocation2 + $0x168] sm:$0xff]   ;;  %v1095_v47 = vld [vmem:[#allocation2 + $0x160] sm:$0xff]  }
  0x1b   :  { %927 = vmatpush3.bf16.msra.mxu0 %v1070_v13  ;;  %v1092_v43 = vld [vmem:[#allocation2 + $0x130] sm:$0xff]   ;;  %v1094_v46 = vld [vmem:[#allocation2 + $0x128] sm:$0xff]   ;;  %v1096_v48 = vld [vmem:[#allocation2 + $0x120] sm:$0xff]  }
  0x1c   :  { %928 = vmatprep.subr.bf16.mxu0 %v1073_v16  ;;  %490 = vmatprep.mubr.bf16.mxu0 %v49_v32  ;;  %v1097_v49 = vld [vmem:[#allocation2 + $0x158] sm:$0xff]   ;;  %v1099_v51 = vld [vmem:[#allocation2 + $0x150] sm:$0xff]   ;;  %v1105_v53 = vld [vmem:[#allocation2 + $0x180] sm:$0xff]  }
  0x1d   :  { %949 = vmatpush3.bf16.msra.mxu1 %v1072_v15  ;;  %v1098_v50 = vld [vmem:[#allocation2 + $0x118] sm:$0xff]   ;;  %v1100_v52 = vld [vmem:[#allocation2 + $0x110] sm:$0xff]   ;;  %v46_v54 = vld [vmem:[%s1296_s0 + $0x28] sm:$0xff] }
  0x1e   :  { %950 = vmatprep.subr.bf16.mxu1 %v1075_v18  ;;  %v1101_v55 = vld [vmem:[#allocation2 + $0x148] sm:$0xff]   ;;  %v53_v56 = vpack.c.bf16 %v46_v54, %v46_v54  ;;  %v47_v57 = vld [vmem:[%s1296_s0 + $0x30] sm:$0xff]  ;;  %v1103_v60 = vld [vmem:[#allocation2 + $0x140] sm:$0xff]  }
  0x1f   :  { %929 = vmatpush3.bf16.msra.mxu0 %v1074_v17  ;;  %v54_v58 = vpack.c.bf16 %v47_v57, %v47_v57  ;;  %v1102_v59 = vld [vmem:[#allocation2 + $0x108] sm:$0xff]   ;;  %v1104_v61 = vld [vmem:[#allocation2 + $0x100] sm:$0xff]   ;;  %v1106_v0 = vld [vmem:[%s1299_s3 + $0x38] sm:$0xff]  }
  0x20   :  { %930 = vmatprep.subr.bf16.mxu0 %v1077_v20  ;;  %v45_v62 = vld [vmem:[%s1296_s0 + $0x20] sm:$0xff]  ;;  %v1107_v1 = vld [vmem:[%s1299_s3 + $0x30] sm:$0xff]   ;;  %v1108_v2 = vld [vmem:[%s1299_s3 + $0x28] sm:$0xff]  }
  0x21   :  { %951 = vmatpush3.bf16.msra.mxu1 %v1076_v19  ;;  %v52_v63 = vpack.c.bf16 %v45_v62, %v45_v62  ;;  %v1109_v3 = vld [vmem:[%s1299_s3 + $0x20] sm:$0xff]   ;;  %v1110_v4 = vld [vmem:[%s1299_s3 + $0x18] sm:$0xff]   ;;  %v1111_v5 = vld [vmem:[%s1299_s3 + $0x10] sm:$0xff]  }
  0x22   :  { %952 = vmatprep.subr.bf16.mxu1 %v1079_v22  ;;  %v1112_v6 = vld [vmem:[%s1299_s3 + $0x8] sm:$0xff]   ;;  %v1113_v7 = vld [vmem:[%s1299_s3] sm:$0xff]   ;;  %v1114_v8 = vld [vmem:[%s1301_s5 + $0x38] sm:$0xff]  }
  0x23   :  { %931 = vmatpush3.bf16.msra.mxu0 %v1078_v21  ;;  %v1115_v9 = vld [vmem:[%s1301_s5 + $0x30] sm:$0xff]   ;;  %v1116_v10 = vld [vmem:[%s1301_s5 + $0x28] sm:$0xff]   ;;  %v1117_v11 = vld [vmem:[%s1301_s5 + $0x20] sm:$0xff]  }
  0x24   :  { %932 = vmatprep.subr.bf16.mxu0 %v1081_v24  ;;  %v1118_v12 = vld [vmem:[%s1301_s5 + $0x18] sm:$0xff]   ;;  %v1119_v13 = vld [vmem:[%s1301_s5 + $0x10] sm:$0xff]   ;;  %v1120_v40 = vld [vmem:[%s1301_s5 + $0x8] sm:$0xff]  }
  0x25   :  { %953 = vmatpush3.bf16.msra.mxu1 %v1080_v23 }
  0x26   :  { %954 = vmatprep.subr.bf16.mxu1 %v1083_v26 }
  0x27   :  { %933 = vmatpush3.bf16.msra.mxu0 %v1082_v25 }
  0x28   :  { %934 = vmatprep.subr.bf16.mxu0 %v1085_v28 }
  0x29   :  { %955 = vmatpush3.bf16.msra.mxu1 %v1084_v27  ;;  %v851_v27 = vld [vmem:[%s1298_s2] ss:$0 sm:$0xff] }
  0x2a   :  { %956 = vmatprep.subr.bf16.mxu1 %v1087_v30 }
  0x2b   :  { %935 = vmatpush3.bf16.msra.mxu0 %v1086_v29 }
  0x2c   :  { %964 = vmatprep.subr.bf16.mxu0 %v1089_v36 }
  0x2d   :  { %957 = vmatpush3.bf16.msra.mxu1 %v1088_v33 }
  0x2e   :  { %491 = vmatmul.mubr.bf16.vlgmr.msra.gmra.mxu0 %v48_v35  ;;  %1006 = vmatprep.subr.bf16.mxu1 %v1147_v44 }
  0x2f   :  { %965 = vmatpush3.bf16.msra.mxu0 %v1090_v39  ;;  %570 = vmatprep.mubr.bf16.mxu0 %v53_v56 }
  0x30   :  { %531 = vmatmul.mubr.bf16.vlgmr.msra.gmra.mxu1 %v50_v41  ;;  %966 = vmatprep.subr.bf16.mxu0 %v1091_v42  ;;  %v1121_v41 = vld [vmem:[%s1301_s5] sm:$0xff]  }
  0x31   :  { %1008 = vmatprep.mubr.msk.bf16.mxu1 %vm1148_vm0, %v1147_v44  ;;  %1007 = vmatpush3.bf16.msra.mxu1 %v1105_v53  ;;  %v902_v42 = vld [vmem:[%s1300_s4] ss:$0 sm:$0xff] }
  0x32   :  { %1012 = vmatprep.subr.bf16.mxu1 %v1147_v44 }
  0x33   :  { %967 = vmatpush3.bf16.msra.mxu0 %v1092_v43 }
  0x34   :  { %968 = vmatprep.subr.bf16.mxu0 %v1093_v45 }
  0x37   :  { %969 = vmatpush3.bf16.msra.mxu0 %v1094_v46 }
  0x38   :  { %970 = vmatprep.subr.bf16.mxu0 %v1095_v47  ;;  %1009 = vmatmul.mubr.msk.bf16.vlgmr.msra.gmra.mxu1 %vm454_vm1, %v54_v58 }
  0x39   :  { %1028 = vmatprep.mubr.msk.bf16.mxu1 %vm1148_vm0, %v1147_v44  ;;  %1013 = vmatpush3.bf16.msra.mxu1 %v1106_v0 }
  0x3a   :  { %1014 = vmatprep.subr.bf16.mxu1 %v1147_v44 }
  0x3b   :  { %971 = vmatpush3.bf16.msra.mxu0 %v1096_v48 }
  0x3c   :  { %972 = vmatprep.subr.bf16.mxu0 %v1097_v49 }
  0x3d   :  { %1015 = vmatpush3.bf16.msra.mxu1 %v1107_v1 }
  0x3e   :  { %1016 = vmatprep.subr.bf16.mxu1 %v1147_v44 }
  0x3f   :  { %973 = vmatpush3.bf16.msra.mxu0 %v1098_v50 }
  0x40   :  { %974 = vmatprep.subr.bf16.mxu0 %v1099_v51 }
  0x41   :  { %1017 = vmatpush3.bf16.msra.mxu1 %v1108_v2 }
  0x42   :  { %1018 = vmatprep.subr.bf16.mxu1 %v1147_v44 }
  0x43   :  { %975 = vmatpush3.bf16.msra.mxu0 %v1100_v52 }
  0x44   :  { %976 = vmatprep.subr.bf16.mxu0 %v1101_v55 }
  0x45   :  { %1019 = vmatpush3.bf16.msra.mxu1 %v1109_v3 }
  0x46   :  { %1020 = vmatprep.subr.bf16.mxu1 %v1147_v44 }
  0x47   :  { %977 = vmatpush3.bf16.msra.mxu0 %v1102_v59 }
  0x48   :  { %978 = vmatprep.subr.bf16.mxu0 %v1103_v60 }
  0x49   :  { %1021 = vmatpush3.bf16.msra.mxu1 %v1110_v4 }
  0x4a   :  { %1022 = vmatprep.subr.bf16.mxu1 %v1147_v44 }
  0x4b   :  { %979 = vmatpush3.bf16.msra.mxu0 %v1104_v61 }
  0x4c   :  { %1032 = vmatprep.subr.bf16.mxu0 %v1147_v44 }
  0x4d   :  { %1023 = vmatpush3.bf16.msra.mxu1 %v1111_v5 }
  0x4e   :  { %571 = vmatmul.mubr.bf16.vlgmr.msra.gmra.mxu0 %v52_v63  ;;  %1024 = vmatprep.subr.bf16.mxu1 %v1147_v44 }
  0x4f   :  { %1048 = vmatprep.mubr.msk.bf16.mxu0 %vm1148_vm0, %v1147_v44  ;;  %1033 = vmatpush3.bf16.msra.mxu0 %v1114_v8 }
  0x50   :  { %1034 = vmatprep.subr.bf16.mxu0 %v1147_v44 }
  0x51   :  { %1025 = vmatpush3.bf16.msra.mxu1 %v1112_v6 }
  0x52   :  { %1026 = vmatprep.subr.bf16.mxu1 %v1147_v44 }
  0x53   :  { %1035 = vmatpush3.bf16.msra.mxu0 %v1115_v9 }
  0x54   :  { %1036 = vmatprep.subr.bf16.mxu0 %v1147_v44 }
  0x55   :  { %1027 = vmatpush3.bf16.msra.mxu1 %v1113_v7 }
  0x57   :  { %1037 = vmatpush3.bf16.msra.mxu0 %v1116_v10 }
  0x58   :  { %1038 = vmatprep.subr.bf16.mxu0 %v1147_v44 }
  0x5b   :  { %1039 = vmatpush3.bf16.msra.mxu0 %v1117_v11 }
  0x5c   :  { %1040 = vmatprep.subr.bf16.mxu0 %v1147_v44 }
  0x5f   :  { %1041 = vmatpush3.bf16.msra.mxu0 %v1118_v12 }
  0x60   :  { %1042 = vmatprep.subr.bf16.mxu0 %v1147_v44 }
  0x63   :  { %1043 = vmatpush3.bf16.msra.mxu0 %v1119_v13 }
  0x64   :  { %1044 = vmatprep.subr.bf16.mxu0 %v1147_v44 }
  0x67   :  { %1045 = vmatpush3.bf16.msra.mxu0 %v1120_v40 }
  0x68   :  { %1046 = vmatprep.subr.bf16.mxu0 %v1147_v44  ;;  %v911_v44 = vld [vmem:[%s1302_s6] ss:$0 sm:$0xff] }
  0x6b   :  { %1047 = vmatpush3.bf16.msra.mxu0 %v1121_v41 }
  0xee   :  { %v936_v14 = vpop.f32.mrf.mxu0 }
  0xf0   :  { %v937_v15 = vpop.f32.mrf.mxu0  ;;  %v958_v16 = vpop.f32.mrf.mxu1 }
  0xf1   :  { %v938_v26 = vadd.f32 %v937_v15, %v936_v14 }
  0xf2   :  { %v939_v17 = vpop.f32.mrf.mxu0  ;;  %v959_v18 = vpop.f32.mrf.mxu1 }
  0xf3   :  { %v493_v28 = vadd.f32 %v938_v26, %v851_v27  ;;  %v960_v29 = vadd.f32 %v959_v18, %v958_v16 }
  0xf4   :  { %v940_v19 = vpop.f32.mrf.mxu0  ;;  %v961_v20 = vpop.f32.mrf.mxu1 }
  0xf5   :  { %v533_v32 = vadd.f32 %v960_v29, %v493_v28 }
  0xf6   :  { %v962_v21 = vpop.f32.mrf.mxu1 }
  0xf8   :  { %v612_v22 = vpop.f32.mrf.mxu1 }
  0xfa   :  { %v1010_v23 = vpop.f32.mrf.mxu1 }
  0xfc   :  { %v615_v24 = vpop.f32.mrf.mxu1 }
  0xfe   :  { %v1011_v25 = vpop.f32.mrf.mxu1 }
 0x10e   :  { %v980_v30 = vpop.f32.mrf.mxu0 }
 0x110   :  { %v981_v31 = vpop.f32.mrf.mxu0 }
 0x111   :  { %v982_v33 = vadd.f32 %v981_v31, %v980_v30 }
 0x112   :  { %v983_v34 = vpop.f32.mrf.mxu0 }
 0x113   :  { %v573_v35 = vadd.f32 %v982_v33, %v533_v32 }
 0x114   :  { %v984_v36 = vpop.f32.mrf.mxu0 }
 0x115   :  { %v613_v37 = vadd.f32 %v612_v22, %v573_v35 }
 0x117   :  { %v618_v38 = vmax.f32 %v613_v37, 0.0 }
 0x119   :  { %v619_v39 = vpack.c.bf16 %v618_v38, %v618_v38 }
 0x11b   :  { %1029 = vmatmul.mubr.bf16.vlgmr.msra.gmra.mxu1 %v619_v39 }
 0x1db   :  { %v725_v43 = vpop.f32.mrf.mxu1 }
 0x1dc   :  { %v726_v45 = vadd.f32 %v902_v42, %v725_v43 }
 0x1dd   :  { %v1030_v46 = vpop.f32.mrf.mxu1 }
 0x1de   :  { %v731_v47 = vmax.f32 %v726_v45, 0.0 }
 0x1df   :  { %v728_v48 = vpop.f32.mrf.mxu1 }
 0x1e0   :  { %v732_v49 = vpack.c.bf16 %v731_v47, %v731_v47 }
 0x1e1   :  { %v1031_v50 = vpop.f32.mrf.mxu1 }
 0x1e2   :  { %1049 = vmatmul.mubr.bf16.vlgmr.msra.gmra.mxu0 %v732_v49 }
 0x2a2   :  { %v838_v51 = vpop.f32.mrf.mxu0 }
 0x2a3   :  { %v839_v52 = vadd.f32 %v911_v44, %v838_v51 }
 0x2a4   :  { %v1050_v53 = vpop.f32.mrf.mxu0 }
 0x2a5   :  { %v844_v54 = vpack.c.bf16 %v839_v52, %v839_v52 }
 0x2a6   :  { %v841_v55 = vpop.f32.mrf.mxu0 }
 0x2a7   :  { %845 = vst [vmem:[%s1303_s7] sm:$0xf] %v844_v54 }
 0x2a8   :  { %v1051_v56 = vpop.f32.mrf.mxu0 }
 0x2a9   :  { %850 = vsyncpa [#allocation3], 1 }

</bundles_post_ra>
